<compile_context>
chip_gen: v7x
topology: tpu7x:2x2x1
jax: 0.10.0
libtpu: 0.0.40
codegen_flags: <defaults>
</compile_context>

<pallas_src>
import math

import jax
import jax.numpy as jnp
from jax import lax
from jax.experimental import pallas as pl
from jax.experimental.pallas import tpu as pltpu


def _round_up(x, m):
    return ((x + m - 1) // m) * m


def _pick_tile(dim, cap, align):
    """Return (tile, padded_dim).

    Full extent (zero padding) when dim <= cap — block == full array dim is
    always legal. Otherwise pad dim minimally to a multiple of `align` and pick
    the largest tile that is a multiple of `align`, <= cap, and divides the
    padded dim (so padding never exceeds align-1 elements).
    """
    if dim <= cap:
        return dim, dim
    padded = _round_up(dim, align)
    best = align
    for t in range(align, cap + 1, align):
        if padded % t == 0:
            best = t
    return best, padded


# --------------- resident-weight fast path (no K grid axis, no acc RMW) ------

def _resident_kernel(x_ref, w_ref, b_ref, o_ref):
    # x: (tm, K), w: (N, K) [PyTorch (out, in) layout], b: (1, N), o: (tm, N)
    z = lax.dot_general(
        x_ref[...],
        w_ref[...],
        dimension_numbers=(((1,), (1,)), ((), ())),   # 'mk,nk->mn'
        preferred_element_type=jnp.float32,
    ) + b_ref[...]
    o_ref[...] = jnp.maximum(z, 0.2 * z).astype(o_ref.dtype)


# --------------- tiled (M, N, K) path with f32 VMEM accumulator --------------

def _tiled_kernel(x_ref, w_ref, b_ref, o_ref, acc_ref):
    @pl.when(pl.program_id(2) == 0)
    def _init():
        # Seed the accumulator with the bias -> no epilogue add needed.
        acc_ref[...] = pl.broadcast_to(
            b_ref[...].astype(jnp.float32), acc_ref.shape)

    acc_ref[...] += lax.dot_general(
        x_ref[...],
        w_ref[...],
        dimension_numbers=(((1,), (1,)), ((), ())),   # 'mk,nk->mn'
        preferred_element_type=jnp.float32,
    )

    @pl.when(pl.program_id(2) == pl.num_programs(2) - 1)
    def _finalize():
        z = acc_ref[...]
        o_ref[...] = jnp.maximum(z, 0.2 * z).astype(o_ref.dtype)


def linear_layer_forward(
    x,
    weight,
    bias,
    *,
    bf16_operands=False,        # opt-in: bf16 x/W operands, f32 accumulation
    tm_cap=512,
    tn_cap=512,
    tk_cap=2048,
    resident_budget_bytes=28 << 20,   # VMEM budget for the fast path (<= v7x scoped)
):
    """x: (..., K), weight: (N, K) [PyTorch layout], bias: (N,). Returns (..., N)."""
    orig_shape = x.shape
    out_dtype = x.dtype
    x2 = x.reshape(-1, orig_shape[-1])
    M, K = x2.shape
    N, K2 = weight.shape
    assert K == K2, (K, K2)

    op_dtype = jnp.bfloat16 if bf16_operands else x2.dtype
    in_bytes = jnp.dtype(op_dtype).itemsize
    out_bytes = jnp.dtype(out_dtype).itemsize

    # ------------------ resident-weight fast path --------------------------
    # Weight (double-buffered) + bias must fit comfortably; then pick the
    # largest M-tile whose x/out buffers keep the total under budget.
    w_res_bytes = 2 * N * K * in_bytes + 2 * N * 4
    fast_cfg = None
    if w_res_bytes <= min(resident_budget_bytes, 16 << 20):
        cap = tm_cap
        while cap >= 8:
            tm_f, Mp_f = _pick_tile(M, cap, 8)
            total = (w_res_bytes
                     + 2 * tm_f * K * in_bytes
                     + 2 * tm_f * N * out_bytes)
            if total <= resident_budget_bytes:
                fast_cfg = (tm_f, Mp_f, total)
                break
            cap //= 2

    if fast_cfg is not None:
        tm, Mp, ws = fast_cfg
        xp = x2 if Mp == M else jnp.pad(x2, ((0, Mp - M), (0, 0)))
        if bf16_operands:
            xp = xp.astype(op_dtype)
            wq = weight.astype(op_dtype)
        else:
            wq = weight
        bp = bias.reshape(1, N).astype(jnp.float32)
        vmem_limit = int(min(max(ws + (4 << 20), 16 << 20), 48 << 20))

        out = pl.pallas_call(
            _resident_kernel,
            out_shape=jax.ShapeDtypeStruct((Mp, N), out_dtype),
            grid=(Mp // tm,),
            in_specs=[
                pl.BlockSpec((tm, K), lambda i: (i, 0)),   # x: streamed M-tiles
                pl.BlockSpec((N, K), lambda i: (0, 0)),    # weight: resident
                pl.BlockSpec((1, N), lambda i: (0, 0)),    # bias: resident
            ],
            out_specs=pl.BlockSpec((tm, N), lambda i: (i, 0)),
            compiler_params=pltpu.CompilerParams(
                dimension_semantics=("parallel",),
                vmem_limit_bytes=vmem_limit,
            ),
        )(xp, wq, bp)
        if Mp != M:
            out = out[:M]
        return out.reshape(*orig_shape[:-1], N)

    # ------------------ general tiled (M, N, K) path -----------------------
    tm, Mp = _pick_tile(M, tm_cap, 8)      # sublane-aligned (or full extent)
    tn, Np = _pick_tile(N, tn_cap, 128)    # lane-aligned (or full extent)
    tk, Kp = _pick_tile(K, tk_cap, 128)    # lane-aligned (or full extent)

    xp = x2
    if (Mp, Kp) != (M, K):
        xp = jnp.pad(xp, ((0, Mp - M), (0, Kp - K)))
    wp = weight
    if (Np, Kp) != (N, K):
        wp = jnp.pad(wp, ((0, Np - N), (0, Kp - K)))
    if bf16_operands:
        xp = xp.astype(op_dtype)
        wp = wp.astype(op_dtype)
    bp = (bias if Np == N else jnp.pad(bias, (0, Np - N)))
    bp = bp.reshape(1, Np).astype(jnp.float32)
    # TODO(synk): when this layer is called repeatedly with the same weights,
    # hoist the weight/bias padding (and optional bf16 cast) out of this call.

    # Double-buffered working set -> explicit VMEM limit (capped for v7x).
    ws = (2 * tm * tk * in_bytes + 2 * tn * tk * in_bytes
          + 2 * tm * tn * out_bytes + tm * tn * 4 + 2 * tn * 4)
    vmem_limit = int(min(max(ws + (4 << 20), 16 << 20), 48 << 20))

    grid = (Mp // tm, Np // tn, Kp // tk)
    out = pl.pallas_call(
        _tiled_kernel,
        out_shape=jax.ShapeDtypeStruct((Mp, Np), out_dtype),
        grid=grid,
        in_specs=[
            pl.BlockSpec((tm, tk), lambda i, j, k: (i, k)),   # x
            pl.BlockSpec((tn, tk), lambda i, j, k: (j, k)),   # weight (N, K)
            pl.BlockSpec((1, tn), lambda i, j, k: (0, j)),    # bias (k-invariant)
        ],
        out_specs=pl.BlockSpec((tm, tn), lambda i, j, k: (i, j)),
        scratch_shapes=[pltpu.VMEM((tm, tn), jnp.float32)],
        compiler_params=pltpu.CompilerParams(
            dimension_semantics=("parallel", "parallel", "arbitrary"),
            vmem_limit_bytes=vmem_limit,
        ),
    )(xp, wp, bp)
    if (Mp, Np) != (M, N):
        out = out[:M, :N]
    return out.reshape(*orig_shape[:-1], N)


def init_params(key, in_dim, out_dim):
    """Deterministic re-implementation of the PyTorch __init__ initializers."""
    k_w, k_b = jax.random.split(key)
    # kaiming_normal_(a=0.2): std = gain / sqrt(fan_in), gain = sqrt(2/(1+a^2))
    gain = math.sqrt(2.0 / (1.0 + 0.2 ** 2))
    std = gain / math.sqrt(in_dim)
    weight = jax.random.normal(k_w, (out_dim, in_dim), jnp.float32) * std
    # bias ~ U(-sqrt(1/in_dim), sqrt(1/in_dim))
    bound = math.sqrt(1.0 / in_dim)
    bias = jax.random.uniform(k_b, (out_dim,), jnp.float32, -bound, bound)
    return weight, bias


def _reference(x, weight, bias):
    z = x @ weight.T + bias[None, :]
    return jnp.where(z >= 0.0, z, 0.2 * z)


if __name__ == "__main__":
    key = jax.random.PRNGKey(0)

    # --- demo-sized case (module-consistent small shapes) -> resident path ---
    batch, in_dim, out_dim = 8, 32, 128
    k_x, k_p, key = jax.random.split(key, 3)
    x = jax.random.normal(k_x, (batch, in_dim), jnp.float32)
    weight, bias = init_params(k_p, in_dim, out_dim)

    out = jax.block_until_ready(linear_layer_forward(x, weight, bias))
    ref = _reference(x, weight, bias)
    assert out.shape == (batch, out_dim)
    assert jnp.allclose(out, ref, atol=1e-5, rtol=1e-5)

    # --- opt-in bf16-operand path (f32 accumulation), loose tolerance --------
    out_bf16 = jax.block_until_ready(
        linear_layer_forward(x, weight, bias, bf16_operands=True))
    assert out_bf16.shape == (batch, out_dim)
    assert jnp.allclose(out_bf16, ref, atol=5e-2, rtol=5e-2)

    # --- force the tiled (M, N, K) path: multi-step K reduction + N padding ---
    M2, K2, N2 = 256, 384, 320
    k_x2, k_p2, key = jax.random.split(key, 3)
    x2 = jax.random.normal(k_x2, (M2, K2), jnp.float32)
    w2, b2 = init_params(k_p2, K2, N2)

    out2 = jax.block_until_ready(
        linear_layer_forward(
            x2, w2, b2,
            resident_budget_bytes=0,      # disable fast path for this test
            tm_cap=128, tn_cap=128, tk_cap=128,
        ))
    ref2 = _reference(x2, w2, b2)
    assert out2.shape == (M2, N2)
    assert jnp.allclose(out2, ref2, atol=1e-4, rtol=1e-4)

    print("KERNEL_OK")
</pallas_src>

<mosaic_0001>
module attributes {stable_mosaic.version = 11 : i64} {
  func.func @_resident_kernel(%arg0: i32, %arg1: memref<8x32xf32, #tpu.memory_space<vmem>>, %arg2: memref<128x32xf32, #tpu.memory_space<vmem>>, %arg3: memref<1x128xf32, #tpu.memory_space<vmem>>, %arg4: memref<8x128xf32, #tpu.memory_space<vmem>>) attributes {dimension_semantics = [#tpu.dimension_semantics<parallel>], iteration_bounds = array<i64: 1>, scalar_prefetch = 0 : i64, scratch_operands = 0 : i64, tpu.core_type = #tpu.core_type<tc>, window_params = [{transform_indices = @transform_0, window_bounds = array<i64: 8, 32>}, {pipeline_mode = #tpu.pipeline_mode<synchronous>, transform_indices = @transform_1, window_bounds = array<i64: 128, 32>}, {pipeline_mode = #tpu.pipeline_mode<synchronous>, transform_indices = @transform_2, window_bounds = array<i64: 1, 128>}, {transform_indices = @transform_3, window_bounds = array<i64: 8, 128>}]} {
    %c0 = arith.constant 0 : index
    %c0_0 = arith.constant 0 : index
    %0 = vector.load %arg1[%c0, %c0_0] : memref<8x32xf32, #tpu.memory_space<vmem>>, vector<8x32xf32>
    %c0_1 = arith.constant 0 : index
    %c0_2 = arith.constant 0 : index
    %1 = vector.load %arg2[%c0_1, %c0_2] : memref<128x32xf32, #tpu.memory_space<vmem>>, vector<128x32xf32>
    %cst = arith.constant dense<0.000000e+00> : vector<8x128xf32>
    %2 = tpu.matmul %0, %1, %cst {dimension_numbers = #tpu.dot_dimension_numbers<[1], [1], [0], [0], [0, 0, 1, 0], [], []>} : vector<8x32xf32>, vector<128x32xf32>, vector<8x128xf32> -> vector<8x128xf32>
    %c0_3 = arith.constant 0 : index
    %c0_4 = arith.constant 0 : index
    %3 = vector.load %arg3[%c0_3, %c0_4] : memref<1x128xf32, #tpu.memory_space<vmem>>, vector<1x128xf32>
    %4 = vector.broadcast %3 : vector<1x128xf32> to vector<8x128xf32>
    %5 = arith.addf %2, %4 : vector<8x128xf32>
    %cst_5 = arith.constant 2.000000e-01 : f32
    %6 = vector.broadcast %cst_5 : f32 to vector<8x128xf32>
    %7 = arith.mulf %6, %5 : vector<8x128xf32>
    %8 = arith.maximumf %5, %7 : vector<8x128xf32>
    %c0_6 = arith.constant 0 : index
    %c0_7 = arith.constant 0 : index
    %9 = vector.load %arg4[%c0_6, %c0_7] : memref<8x128xf32, #tpu.memory_space<vmem>>, vector<8x128xf32>
    tpu.vector_store %arg4[%c0_6, %c0_7], %8 {strides = array<i32>} : memref<8x128xf32, #tpu.memory_space<vmem>>, vector<8x128xf32>,
    return
  }
  func.func @transform_0(%arg0: i32) -> (i32, i32) {
    %c0_i32 = arith.constant 0 : i32
    %c0_i32_0 = arith.constant 0 : i32
    return %arg0, %c0_i32 : i32, i32
  }
  func.func @transform_1(%arg0: i32) -> (i32, i32) {
    %c0_i32 = arith.constant 0 : i32
    %c0_i32_0 = arith.constant 0 : i32
    %c0_i32_1 = arith.constant 0 : i32
    return %c0_i32, %c0_i32_0 : i32, i32
  }
  func.func @transform_2(%arg0: i32) -> (i32, i32) {
    %c0_i32 = arith.constant 0 : i32
    %c0_i32_0 = arith.constant 0 : i32
    %c0_i32_1 = arith.constant 0 : i32
    return %c0_i32, %c0_i32_0 : i32, i32
  }
  func.func @transform_3(%arg0: i32) -> (i32, i32) {
    %c0_i32 = arith.constant 0 : i32
    %c0_i32_0 = arith.constant 0 : i32
    return %arg0, %c0_i32 : i32, i32
  }
}

</mosaic_0001>

<bundles_post_ra>
// kernel: tpu_custom_call.1
= control target key start
LH: loop header
LB: loop body
LE: loop exit
PB: predicated region body
PF: predicated region fallthrough
CT: control target
= control target key end

     0   :  { %vm39_vm0 = vcmask 261120   ;;  %v308_v2 = vmov 0.0|0.0   ;;  %vm309_vm2 = vmmov 0   ;;  %v310_v5 = vmov 0.0   ;;  %s421_s0 = inlined_call_operand.vmem [shape: f32[8,32], index: 0, kind: input, shape index: {}]   ;;  %s422_s1 = inlined_call_operand.vmem [shape: f32[128,32], index: 1, kind: input, shape index: {}]   ;;  %s423_s2 = inlined_call_operand.vmem [shape: f32[1,128], index: 2, kind: input, shape index: {}]   ;;  %s424_s3 = inlined_call_operand.hbm [shape: f32[8,128], index: 3, kind: output, shape index: {}]  }
   0x1   :  { %v16_v0 = vld [vmem:[%s422_s1] sm:$0xff]  ;;  %v17_v1 = vld [vmem:[%s422_s1 + $0x8] sm:$0xff]  ;;  %248 = vmatprep.subr.bf16.mxu0 %v308_v2  ;;  %vm340_vm1 = vmpackc.low %vm39_vm0, %vm39_vm0  ;;  %245 = vmatprep.mubr.msk.f32.mxu0 %vm309_vm2, %v310_v5 }
   0x2   :  { %v249_v3 = vpack.c.bf16 %v17_v1, %v16_v0  ;;  %v18_v6 = vld [vmem:[%s422_s1 + $0x10] sm:$0xff]  ;;  %v19_v7 = vld [vmem:[%s422_s1 + $0x18] sm:$0xff] }
   0x4   :  { %251 = vmatpush3.bf16.xpose.msk.msra.mxu0 %vm340_vm1, %v249_v3 }
   0x5   :  { %252 = vmatprep.subr.bf16.mxu0 %v308_v2 }
   0x6   :  { %8 = vsyncpa [#allocation3], 0  ;;  %v253_v8 = vpack.c.bf16 %v19_v7, %v18_v6  ;;  %v20_v9 = vld [vmem:[%s422_s1 + $0x20] sm:$0xff]  ;;  %v21_v10 = vld [vmem:[%s422_s1 + $0x28] sm:$0xff]  ;;  %s311_s21 = smov [#allocation2]  }
   0x7   :  { %v257_v11 = vpack.c.bf16 %v21_v10, %v20_v9  ;;  %v22_v12 = vld [vmem:[%s422_s1 + $0x30] sm:$0xff]  ;;  %v23_v13 = vld [vmem:[%s422_s1 + $0x38] sm:$0xff]  ;;  %v24_v15 = vld [vmem:[%s422_s1 + $0x40] sm:$0xff]  ;;  %s170_s22 = sshll.u32 %s311_s21, 4  ;;  %s171_s22 = int_to_ptr.vmem [resolvable:$true] %s170_s22 }
   0x8   :  { %v261_v14 = vpack.c.bf16 %v23_v13, %v22_v12  ;;  %v25_v16 = vld [vmem:[%s422_s1 + $0x48] sm:$0xff]  ;;  %v26_v18 = vld [vmem:[%s422_s1 + $0x50] sm:$0xff]  ;;  %v27_v19 = vld [vmem:[%s422_s1 + $0x58] sm:$0xff]  ;;  %p289_p1 = scmp.lt.s32.totalorder %s171_s22, %s171_s22 }
   0x9   :  { %v265_v17 = vpack.c.bf16 %v25_v16, %v24_v15  ;;  %v269_v20 = vpack.c.bf16 %v27_v19, %v26_v18  ;;  %v28_v21 = vld [vmem:[%s422_s1 + $0x60] sm:$0xff]  ;;  %v29_v22 = vld [vmem:[%s422_s1 + $0x68] sm:$0xff]  ;;  %v30_v24 = vld [vmem:[%s422_s1 + $0x70] sm:$0xff] }
   0xa   :  { %v273_v23 = vpack.c.bf16 %v29_v22, %v28_v21  ;;  %v31_v25 = vld [vmem:[%s422_s1 + $0x78] sm:$0xff]  ;;  %v15_v27 = vld [vmem:[%s421_s0] sm:$0xff]  ;;  %s284_s1 = scalar_lea.vmem %s171_s22, 128 }
   0xb   :  { %v277_v26 = vpack.c.bf16 %v31_v25, %v30_v24  ;;  %v178_v28 = vld [vmem:[%s423_s2] ss:$0 sm:$0xff]  ;;  %p285_p0 = scmp.ne.s32.totalorder %s171_s22, %s284_s1  ;;  %p290_p2 = scmp.lt.s32.totalorder %s284_s1, %s284_s1 }
   0xc   :  { %255 = vmatpush3.bf16.xpose.msk.msra.mxu0 %vm340_vm1, %v253_v8 }
   0xd   :  { %256 = vmatprep.subr.bf16.mxu0 %v308_v2  ;;  %p291_p3 = por %p290_p2, %p289_p1 }
   0xf   :  { %p292_p4 = pnand %p291_p3, %p285_p0 }
  0x14   :  { %259 = vmatpush3.bf16.xpose.msk.msra.mxu0 %vm340_vm1, %v257_v11 }
  0x15   :  { %260 = vmatprep.subr.bf16.mxu0 %v308_v2 }
  0x1c   :  { %263 = vmatpush3.bf16.xpose.msk.msra.mxu0 %vm340_vm1, %v261_v14 }
  0x1d   :  { %264 = vmatprep.subr.bf16.mxu0 %v308_v2 }
  0x24   :  { %267 = vmatpush3.bf16.xpose.msk.msra.mxu0 %vm340_vm1, %v265_v17 }
  0x25   :  { %268 = vmatprep.subr.bf16.mxu0 %v308_v2 }
  0x2c   :  { %271 = vmatpush3.bf16.xpose.msk.msra.mxu0 %vm340_vm1, %v269_v20 }
  0x2d   :  { %272 = vmatprep.subr.bf16.mxu0 %v308_v2 }
  0x34   :  { %275 = vmatpush3.bf16.xpose.msk.msra.mxu0 %vm340_vm1, %v273_v23 }
  0x35   :  { %276 = vmatprep.subr.bf16.mxu0 %v308_v2 }
  0x3c   :  { %279 = vmatpush3.bf16.xpose.msk.msra.mxu0 %vm340_vm1, %v277_v26 }
  0x43   :  { %246 = vmatmul.mubr.msk.f32.vlgmr.msra.gmra.mrb[0].mxu0 %vm39_vm0, %v15_v27 }
 0x116   :  { %v157_v29 = vpop.f32.mrb[0].mxu0 }
 0x117   :  { %v158_v30 = vadd.f32 %v178_v28, %v157_v29  ;;  %v247_v31 = vpop.f32.mrb[1].mxu0 }
 0x119   :  { %v161_v32 = vmul.f32 0.2, %v158_v30 }
 0x11b   :  { %v162_v33 = vmax.f32 %v158_v30, %v161_v32 }
 0x11d   :  { %163 = vst [vmem:[#allocation2] sm:$0xff] %v162_v33 }
 0x11e   :  { %295 = shalt.err (!%p292_p4)
}
 0x11f   :  { %s296_s2 = scalar_lea.hbm %s424_s3, 128 }
 0x120   :  { %p297_p5 = scmp.ne.s32.totalorder %s424_s3, %s296_s2  ;;  %p300_p6 = scmp.lt.u32.totalorder %s296_s2, %s424_s3 }
 0x122   :  { %p302_p7 = pnand %p300_p6, %p297_p5 }
 0x124   :  { %305 = shalt.err (!%p302_p7)
}
 0x125   :  { %173 = dma.vmem_to_hbm [thread:$0]  %s171_s22, 128, %s424_s3, [#allocation3]  }
 0x126   :  { %306 = dma.done.wait [#allocation3], 128  }
 0x127   :  { %307 = vsyncadd [#allocation3], 4294967168 }
 0x128   :  { %177 = vsyncpa [#allocation3], 1 }

</bundles_post_ra>
